<compile_context>
chip_gen: v7x
topology: tpu7x:2x2x1
jax: 0.10.0
libtpu: 0.0.40
codegen_flags: <defaults>
</compile_context>

<pallas_src>
import functools

import jax
import jax.numpy as jnp
from jax.experimental import pallas as pl
from jax.experimental.pallas import tpu as pltpu


def _round_up(x, m):
    return ((x + m - 1) // m) * m


def _cdiv(a, b):
    return (a + b - 1) // b


def classnet_kernel(x_ref, w1_ref, b1_ref, w2_ref, b2_ref, o_ref):
    # fc1: x arrives f32 from HBM; cast to bf16 in-VMEM (free on the VPU, saves a whole
    # wrapper HBM pass), MXU matmul with f32 accumulation, bias + ReLU in f32.
    x = x_ref[...].astype(jnp.bfloat16)
    h = jnp.dot(x, w1_ref[...], preferred_element_type=jnp.float32)
    h = jnp.maximum(h + b1_ref[...], 0.0)
    # fc2: bf16 MXU matmul, f32 accumulate, bias, store as bf16 (lane-dense C_pad).
    out = jnp.dot(h.astype(jnp.bfloat16), w2_ref[...],
                  preferred_element_type=jnp.float32)
    o_ref[...] = (out + b2_ref[...]).astype(o_ref.dtype)


def prepare_params(w1, b1, w2, b2):
    """One-time dtype/layout plumbing. Call once at init, NOT per forward call."""
    H = w1.shape[1]
    C = w2.shape[1]
    C_pad = _round_up(C, 128)  # lane-dense fc2 output (unmasked vst, full MXU lanes)
    w1_bf = w1.astype(jnp.bfloat16)
    b1_2d = b1.reshape(1, H).astype(jnp.float32)
    w2_bf = jnp.pad(w2, ((0, 0), (0, C_pad - C))).astype(jnp.bfloat16)
    b2_2d = jnp.pad(b2, (0, C_pad - C)).reshape(1, C_pad).astype(jnp.float32)
    return w1_bf, b1_2d, w2_bf, b2_2d


@functools.partial(jax.jit, static_argnames=("num_classes", "block_b"))
def classnet_forward(x, w1_bf, b1_2d, w2_bf, b2_2d, *, num_classes, block_b=1024):
    """x: (B, 512) f32; params pre-prepared by prepare_params(). Returns (B, C) bf16 logits."""
    B, K = x.shape
    H = w1_bf.shape[1]          # 256
    C_pad = w2_bf.shape[1]      # numClasses padded to a multiple of 128

    # Batch tiling:
    #  - at least 2 grid steps when B is big enough (v7x: 2 TensorCores; pipeline needs
    #    >=2 steps to overlap x DMA with compute),
    #  - TB sized to cdiv(B, num_tiles) rounded to 16 rows (bf16 output sublane packing),
    #    so padding waste is at most a handful of rows instead of up to TB-1.
    num_tiles = _cdiv(B, block_b)
    if B >= 512:
        num_tiles = max(num_tiles, 2)
    tb_raw = _cdiv(B, num_tiles)
    TB = _round_up(tb_raw, 16 if tb_raw >= 16 else 8)

    out_padded = pl.pallas_call(
        classnet_kernel,
        # Exactly B rows (no row padding / no row slice on return); Pallas clips any
        # ragged last block automatically. Lane dim stays padded (C_pad) for dense vst.
        out_shape=jax.ShapeDtypeStruct((B, C_pad), jnp.bfloat16),
        grid_spec=pltpu.PrefetchScalarGridSpec(
            num_scalar_prefetch=0,
            grid=(num_tiles,),
            in_specs=[
                pl.BlockSpec((TB, K), lambda i: (i, 0)),      # x tile: streamed (f32)
                pl.BlockSpec((K, H), lambda i: (0, 0)),       # w1: VMEM-resident
                pl.BlockSpec((1, H), lambda i: (0, 0)),       # b1: VMEM-resident
                pl.BlockSpec((H, C_pad), lambda i: (0, 0)),   # w2: VMEM-resident
                pl.BlockSpec((1, C_pad), lambda i: (0, 0)),   # b2: VMEM-resident
            ],
            out_specs=pl.BlockSpec((TB, C_pad), lambda i: (i, 0)),
        ),
        compiler_params=pltpu.CompilerParams(
            dimension_semantics=("parallel",),   # shard batch tiles across TCs on v7x
        ),
    )(x, w1_bf, b1_2d, w2_bf, b2_2d)

    # Lane slice only (padding lanes are exact zeros from zero-padded w2/b2); under jit
    # this fuses into the consumer rather than an extra HBM pass.
    return out_padded[:, :num_classes]


def init_params(key, num_classes):
    """Deterministic init mimicking nn.Linear's U(-1/sqrt(fan_in), 1/sqrt(fan_in))."""
    k1, k2, k3, k4 = jax.random.split(key, 4)
    bound1 = 1.0 / jnp.sqrt(512.0)
    bound2 = 1.0 / jnp.sqrt(256.0)
    # Stored as (in, out) = transpose of PyTorch's (out, in) weight layout.
    w1 = jax.random.uniform(k1, (512, 256), jnp.float32, -bound1, bound1)
    b1 = jax.random.uniform(k2, (256,), jnp.float32, -bound1, bound1)
    w2 = jax.random.uniform(k3, (256, num_classes), jnp.float32, -bound2, bound2)
    b2 = jax.random.uniform(k4, (num_classes,), jnp.float32, -bound2, bound2)
    return w1, b1, w2, b2


if __name__ == "__main__":
    num_classes = 10
    batch = 16

    key = jax.random.PRNGKey(0)
    kx, kp = jax.random.split(key)
    x = jax.random.normal(kx, (batch, 512), jnp.float32)
    w1, b1, w2, b2 = init_params(kp, num_classes)

    # One-time param prep (cast/pad outside the jitted forward).
    w1_bf, b1_2d, w2_bf, b2_2d = prepare_params(w1, b1, w2, b2)

    out = classnet_forward(x, w1_bf, b1_2d, w2_bf, b2_2d, num_classes=num_classes)
    jax.block_until_ready(out)

    # Reference check in plain JAX (f32 math). Kernel uses bf16 weights/activations and
    # bf16 logits with f32 accumulation => loosened tolerance.
    ref = jnp.maximum(x @ w1 + b1, 0.0) @ w2 + b2
    assert out.shape == (batch, num_classes)
    out_f32 = out.astype(jnp.float32)
    assert jnp.allclose(out_f32, ref, atol=2e-2, rtol=2e-2), (
        float(jnp.max(jnp.abs(out_f32 - ref))))

    print("KERNEL_OK")
</pallas_src>

<mosaic_0001>
module attributes {stable_mosaic.version = 11 : i64} {
  func.func @classnet_kernel(%arg0: i32, %arg1: memref<16x512xf32, #tpu.memory_space<vmem>>, %arg2: memref<512x256xbf16, #tpu.memory_space<vmem>>, %arg3: memref<1x256xf32, #tpu.memory_space<vmem>>, %arg4: memref<256x128xbf16, #tpu.memory_space<vmem>>, %arg5: memref<1x128xf32, #tpu.memory_space<vmem>>, %arg6: memref<16x128xbf16, #tpu.memory_space<vmem>>) attributes {dimension_semantics = [#tpu.dimension_semantics<parallel>], iteration_bounds = array<i64: 1>, scalar_prefetch = 0 : i64, scratch_operands = 0 : i64, tpu.core_type = #tpu.core_type<tc>, window_params = [{transform_indices = @transform_0, window_bounds = array<i64: 16, 512>}, {pipeline_mode = #tpu.pipeline_mode<synchronous>, transform_indices = @transform_1, window_bounds = array<i64: 512, 256>}, {pipeline_mode = #tpu.pipeline_mode<synchronous>, transform_indices = @transform_2, window_bounds = array<i64: 1, 256>}, {pipeline_mode = #tpu.pipeline_mode<synchronous>, transform_indices = @transform_3, window_bounds = array<i64: 256, 128>}, {pipeline_mode = #tpu.pipeline_mode<synchronous>, transform_indices = @transform_4, window_bounds = array<i64: 1, 128>}, {transform_indices = @transform_5, window_bounds = array<i64: 16, 128>}]} {
    %c0 = arith.constant 0 : index
    %c0_0 = arith.constant 0 : index
    %0 = vector.load %arg1[%c0, %c0_0] : memref<16x512xf32, #tpu.memory_space<vmem>>, vector<16x512xf32>
    %1 = arith.truncf %0 : vector<16x512xf32> to vector<16x512xbf16>
    %c0_1 = arith.constant 0 : index
    %c0_2 = arith.constant 0 : index
    %2 = vector.load %arg2[%c0_1, %c0_2] : memref<512x256xbf16, #tpu.memory_space<vmem>>, vector<512x256xbf16>
    %cst = arith.constant dense<0.000000e+00> : vector<16x256xf32>
    %3 = tpu.matmul %1, %2, %cst {dimension_numbers = #tpu.dot_dimension_numbers<[1], [0], [0], [1], [0, 0, 1, 1], [], []>} : vector<16x512xbf16>, vector<512x256xbf16>, vector<16x256xf32> -> vector<16x256xf32>
    %c0_3 = arith.constant 0 : index
    %c0_4 = arith.constant 0 : index
    %4 = vector.load %arg3[%c0_3, %c0_4] : memref<1x256xf32, #tpu.memory_space<vmem>>, vector<1x256xf32>
    %5 = vector.broadcast %4 : vector<1x256xf32> to vector<16x256xf32>
    %6 = arith.addf %3, %5 : vector<16x256xf32>
    %cst_5 = arith.constant 0.000000e+00 : f32
    %7 = vector.broadcast %cst_5 : f32 to vector<16x256xf32>
    %8 = arith.maximumf %6, %7 : vector<16x256xf32>
    %9 = arith.truncf %8 : vector<16x256xf32> to vector<16x256xbf16>
    %c0_6 = arith.constant 0 : index
    %c0_7 = arith.constant 0 : index
    %10 = vector.load %arg4[%c0_6, %c0_7] : memref<256x128xbf16, #tpu.memory_space<vmem>>, vector<256x128xbf16>
    %cst_8 = arith.constant dense<0.000000e+00> : vector<16x128xf32>
    %11 = tpu.matmul %9, %10, %cst_8 {dimension_numbers = #tpu.dot_dimension_numbers<[1], [0], [0], [1], [0, 0, 1, 1], [], []>} : vector<16x256xbf16>, vector<256x128xbf16>, vector<16x128xf32> -> vector<16x128xf32>
    %c0_9 = arith.constant 0 : index
    %c0_10 = arith.constant 0 : index
    %12 = vector.load %arg5[%c0_9, %c0_10] : memref<1x128xf32, #tpu.memory_space<vmem>>, vector<1x128xf32>
    %13 = vector.broadcast %12 : vector<1x128xf32> to vector<16x128xf32>
    %14 = arith.addf %11, %13 : vector<16x128xf32>
    %15 = arith.truncf %14 : vector<16x128xf32> to vector<16x128xbf16>
    %c0_11 = arith.constant 0 : index
    %c0_12 = arith.constant 0 : index
    %16 = vector.load %arg6[%c0_11, %c0_12] : memref<16x128xbf16, #tpu.memory_space<vmem>>, vector<16x128xbf16>
    tpu.vector_store %arg6[%c0_11, %c0_12], %15 {strides = array<i32>} : memref<16x128xbf16, #tpu.memory_space<vmem>>, vector<16x128xbf16>,
    return
  }
  func.func @transform_0(%arg0: i32) -> (i32, i32) {
    %c0_i32 = arith.constant 0 : i32
    %c0_i32_0 = arith.constant 0 : i32
    return %arg0, %c0_i32 : i32, i32
  }
  func.func @transform_1(%arg0: i32) -> (i32, i32) {
    %c0_i32 = arith.constant 0 : i32
    %c0_i32_0 = arith.constant 0 : i32
    %c0_i32_1 = arith.constant 0 : i32
    return %c0_i32, %c0_i32_0 : i32, i32
  }
  func.func @transform_2(%arg0: i32) -> (i32, i32) {
    %c0_i32 = arith.constant 0 : i32
    %c0_i32_0 = arith.constant 0 : i32
    %c0_i32_1 = arith.constant 0 : i32
    return %c0_i32, %c0_i32_0 : i32, i32
  }
  func.func @transform_3(%arg0: i32) -> (i32, i32) {
    %c0_i32 = arith.constant 0 : i32
    %c0_i32_0 = arith.constant 0 : i32
    %c0_i32_1 = arith.constant 0 : i32
    return %c0_i32, %c0_i32_0 : i32, i32
  }
  func.func @transform_4(%arg0: i32) -> (i32, i32) {
    %c0_i32 = arith.constant 0 : i32
    %c0_i32_0 = arith.constant 0 : i32
    %c0_i32_1 = arith.constant 0 : i32
    return %c0_i32, %c0_i32_0 : i32, i32
  }
  func.func @transform_5(%arg0: i32) -> (i32, i32) {
    %c0_i32 = arith.constant 0 : i32
    %c0_i32_0 = arith.constant 0 : i32
    return %arg0, %c0_i32 : i32, i32
  }
}

</mosaic_0001>

<bundles_post_ra>
// kernel: classnet_forward.1
= control target key start
LH: loop header
LB: loop body
LE: loop exit
PB: predicated region body
PF: predicated region fallthrough
CT: control target
= control target key end

     0   :  { %10 = vsyncpa [#allocation3], 0  ;;  %s1203_s0 = inlined_call_operand.hbm [shape: f32[16,512], index: 0, kind: input, shape index: {}]   ;;  %s1204_s1 = inlined_call_operand.hbm [shape: bf16[512,256], index: 1, kind: input, shape index: {}]   ;;  %s1205_s2 = inlined_call_operand.vmem [shape: f32[1,256], index: 2, kind: input, shape index: {}]   ;;  %s1206_s3 = inlined_call_operand.hbm [shape: bf16[256,128], index: 3, kind: input, shape index: {}]   ;;  %s1207_s4 = inlined_call_operand.vmem [shape: f32[1,128], index: 4, kind: input, shape index: {}]   ;;  %s1208_s5 = inlined_call_operand.hbm [shape: bf16[16,128], index: 5, kind: output, shape index: {}]  }
   0x1   :  { %11 = vsyncpa [#allocation6], 0 }
   0x2   :  { %12 = vsyncpa [#allocation4], 0  ;;  %s1103_s18 = smov [#allocation5]   ;;  %s1009_s22 = scalar_lea.hbm %s1204_s1, 8192 }
   0x3   :  { %s30_s19 = sshll.u32 %s1103_s18, 4  ;;  %p1010_p0 = scmp.ne.s32.totalorder %s1204_s1, %s1009_s22  ;;  %s31_s19 = int_to_ptr.vmem [resolvable:$true] %s30_s19 }
   0x4   :  { %p1013_p1 = scmp.lt.u32.totalorder %s1009_s22, %s1204_s1 }
   0x6   :  { %p1015_p2 = pnand %p1013_p1, %p1010_p0 }
   0x8   :  { %1018 = shalt.err (!%p1015_p2)
}
   0x9   :  { %s1019_s27 = scalar_lea.vmem %s31_s19, 8192  ;;  %p1024_p4 = scmp.lt.s32.totalorder %s31_s19, %s31_s19 }
   0xa   :  { %p1020_p3 = scmp.ne.s32.totalorder %s31_s19, %s1019_s27  ;;  %p1025_p5 = scmp.lt.s32.totalorder %s1019_s27, %s1019_s27 }
   0xc   :  { %p1026_p6 = por %p1025_p5, %p1024_p4 }
   0xe   :  { %p1027_p7 = pnand %p1026_p6, %p1020_p3 }
  0x10   :  { %1030 = shalt.err (!%p1027_p7)
}
  0x11   :  { %s1104_s28 = smov 128   ;;  %s1105_s29 = smov 8  }
  0x12   :  { %36 = dma.hbm_to_vmem [thread:$0]  %s1204_s1, 8192, %s31_s19, [#allocation6], %s1104_s28, %s1104_s28, %s1105_s29  }
  0x13   :  { %s1106_s7 = smov [#allocation2]   ;;  %s1031_s11 = scalar_lea.hbm %s1203_s0, 1024 }
  0x14   :  { %s18_s8 = sshll.u32 %s1106_s7, 4  ;;  %p1032_p8 = scmp.ne.s32.totalorder %s1203_s0, %s1031_s11  ;;  %s19_s8 = int_to_ptr.vmem [resolvable:$true] %s18_s8 }
  0x15   :  { %p1035_p9 = scmp.lt.u32.totalorder %s1031_s11, %s1203_s0 }
  0x17   :  { %p1037_p10 = pnand %p1035_p9, %p1032_p8 }
  0x19   :  { %1040 = shalt.err (!%p1037_p10)
}
  0x1a   :  { %s1041_s16 = scalar_lea.vmem %s19_s8, 1024  ;;  %p1046_p12 = scmp.lt.s32.totalorder %s19_s8, %s19_s8 }
  0x1b   :  { %p1042_p11 = scmp.ne.s32.totalorder %s19_s8, %s1041_s16  ;;  %p1047_p13 = scmp.lt.s32.totalorder %s1041_s16, %s1041_s16 }
  0x1d   :  { %p1048_p0 = por %p1047_p13, %p1046_p12 }
  0x1f   :  { %p1049_p1 = pnand %p1048_p0, %p1042_p11 }
  0x21   :  { %1052 = shalt.err (!%p1049_p1)
}
  0x22   :  { %s1107_s1 = smov 512   ;;  %s1108_s17 = smov 32  }
  0x23   :  { %24 = dma.hbm_to_vmem [thread:$0]  %s1203_s0, 1024, %s19_s8, [#allocation3], %s1107_s1, %s1107_s1, %s1108_s17  }
  0x24   :  { %s1109_s20 = smov [#allocation7]   ;;  %s1053_s24 = scalar_lea.hbm %s1206_s3, 2048 }
  0x25   :  { %s44_s21 = sshll.u32 %s1109_s20, 4  ;;  %p1054_p2 = scmp.ne.s32.totalorder %s1206_s3, %s1053_s24  ;;  %s45_s21 = int_to_ptr.vmem [resolvable:$true] %s44_s21 }
  0x26   :  { %p1057_p3 = scmp.lt.u32.totalorder %s1053_s24, %s1206_s3 }
  0x28   :  { %p1059_p4 = pnand %p1057_p3, %p1054_p2 }
  0x2a   :  { %1062 = shalt.err (!%p1059_p4)
}
  0x2b   :  { %s1063_s29 = scalar_lea.vmem %s45_s21, 2048  ;;  %p1068_p6 = scmp.lt.s32.totalorder %s45_s21, %s45_s21 }
  0x2c   :  { %p1064_p5 = scmp.ne.s32.totalorder %s45_s21, %s1063_s29  ;;  %p1069_p7 = scmp.lt.s32.totalorder %s1063_s29, %s1063_s29 }
  0x2e   :  { %p1070_p8 = por %p1069_p7, %p1068_p6 }
  0x30   :  { %p1071_p9 = pnand %p1070_p8, %p1064_p5 }
  0x32   :  { %1074 = shalt.err (!%p1071_p9)
}
  0x33   :  { %s1110_s0 = smov 64   ;;  %s1111_s30 = smov 4  }
  0x34   :  { %50 = dma.hbm_to_vmem [thread:$0]  %s1206_s3, 2048, %s45_s21, [#allocation6], %s1110_s0, %s1110_s0, %s1111_s30  }
  0x35   :  { %1097 = dma.done.wait [#allocation3], 1024  }
  0x36   :  { %1098 = vsyncadd [#allocation3], 4294966272 }
  0x37   :  { %1099 = dma.done.wait [#allocation6], 10240  }
  0x38   :  { %1100 = vsyncadd [#allocation6], 4294957056  ;;  %v897_v0 = vld [vmem:[#allocation5 + $0x4] ss:$8 sps:$4 sm:$0xff]   ;;  %v901_v2 = vld [vmem:[#allocation5] ss:$8 sps:$4 sm:$0xff]  }
  0x39   :  { %v899_v1 = vld [vmem:[#allocation5 + $0x104] ss:$8 sps:$4 sm:$0xff]   ;;  %471 = vmatprep.subr.bf16.mxu1 %v897_v0  ;;  %v902_v3 = vld [vmem:[#allocation5 + $0x100] ss:$8 sps:$4 sm:$0xff]   ;;  %v903_v4 = vld [vmem:[#allocation5 + $0x14] ss:$8 sps:$4 sm:$0xff]  }
  0x3a   :  { %514 = vmatprep.subr.bf16.mxu0 %v899_v1  ;;  %472 = vmatpush1.bf16.msra.mxu1 %v901_v2  ;;  %v905_v5 = vld [vmem:[#allocation5 + $0x114] ss:$8 sps:$4 sm:$0xff]   ;;  %v907_v6 = vld [vmem:[#allocation5 + $0x10] ss:$8 sps:$4 sm:$0xff]   ;;  %v909_v8 = vld [vmem:[#allocation5 + $0x24] ss:$8 sps:$4 sm:$0xff]  }
  0x3b   :  { %515 = vmatpush1.bf16.msra.mxu0 %v902_v3  ;;  %473 = vmatprep.subr.bf16.mxu1 %v903_v4  ;;  %v908_v7 = vld [vmem:[#allocation5 + $0x110] ss:$8 sps:$4 sm:$0xff]   ;;  %v911_v9 = vld [vmem:[#allocation5 + $0x124] ss:$8 sps:$4 sm:$0xff]   ;;  %v913_v10 = vld [vmem:[#allocation5 + $0x20] ss:$8 sps:$4 sm:$0xff]  }
  0x3c   :  { %516 = vmatprep.subr.bf16.mxu0 %v905_v5  ;;  %v914_v11 = vld [vmem:[#allocation5 + $0x120] ss:$8 sps:$4 sm:$0xff]   ;;  %v915_v12 = vld [vmem:[#allocation5 + $0x34] ss:$8 sps:$4 sm:$0xff]   ;;  %v919_v14 = vld [vmem:[#allocation5 + $0x30] ss:$8 sps:$4 sm:$0xff]  }
  0x3d   :  { %v917_v13 = vld [vmem:[#allocation5 + $0x134] ss:$8 sps:$4 sm:$0xff]   ;;  %v920_v15 = vld [vmem:[#allocation5 + $0x130] ss:$8 sps:$4 sm:$0xff]   ;;  %v921_v16 = vld [vmem:[#allocation5 + $0x44] ss:$8 sps:$4 sm:$0xff]  }
  0x3e   :  { %474 = vmatpush1.bf16.msra.mxu1 %v907_v6  ;;  %v923_v17 = vld [vmem:[#allocation5 + $0x144] ss:$8 sps:$4 sm:$0xff]   ;;  %v925_v18 = vld [vmem:[#allocation5 + $0x40] ss:$8 sps:$4 sm:$0xff]   ;;  %v927_v20 = vld [vmem:[#allocation5 + $0x54] ss:$8 sps:$4 sm:$0xff]  }
  0x3f   :  { %517 = vmatpush1.bf16.msra.mxu0 %v908_v7  ;;  %475 = vmatprep.subr.bf16.mxu1 %v909_v8  ;;  %v926_v19 = vld [vmem:[#allocation5 + $0x140] ss:$8 sps:$4 sm:$0xff]   ;;  %v929_v21 = vld [vmem:[#allocation5 + $0x154] ss:$8 sps:$4 sm:$0xff]   ;;  %v931_v22 = vld [vmem:[#allocation5 + $0x50] ss:$8 sps:$4 sm:$0xff]  }
  0x40   :  { %518 = vmatprep.subr.bf16.mxu0 %v911_v9  ;;  %v932_v23 = vld [vmem:[#allocation5 + $0x150] ss:$8 sps:$4 sm:$0xff]   ;;  %v933_v24 = vld [vmem:[#allocation5 + $0x64] ss:$8 sps:$4 sm:$0xff]   ;;  %v937_v26 = vld [vmem:[#allocation5 + $0x60] ss:$8 sps:$4 sm:$0xff]  }
  0x41   :  { %v935_v25 = vld [vmem:[#allocation5 + $0x164] ss:$8 sps:$4 sm:$0xff]   ;;  %v938_v27 = vld [vmem:[#allocation5 + $0x160] ss:$8 sps:$4 sm:$0xff]   ;;  %v939_v28 = vld [vmem:[#allocation5 + $0x74] ss:$8 sps:$4 sm:$0xff]  }
  0x42   :  { %476 = vmatpush1.bf16.msra.mxu1 %v913_v10  ;;  %v941_v29 = vld [vmem:[#allocation5 + $0x174] ss:$8 sps:$4 sm:$0xff]   ;;  %v943_v30 = vld [vmem:[#allocation5 + $0x70] ss:$8 sps:$4 sm:$0xff]   ;;  %v945_v32 = vld [vmem:[#allocation5 + $0x84] ss:$8 sps:$4 sm:$0xff]  }
  0x43   :  { %519 = vmatpush1.bf16.msra.mxu0 %v914_v11  ;;  %477 = vmatprep.subr.bf16.mxu1 %v915_v12  ;;  %v944_v31 = vld [vmem:[#allocation5 + $0x170] ss:$8 sps:$4 sm:$0xff]   ;;  %v947_v33 = vld [vmem:[#allocation5 + $0x184] ss:$8 sps:$4 sm:$0xff]   ;;  %v949_v34 = vld [vmem:[#allocation5 + $0x80] ss:$8 sps:$4 sm:$0xff]  }
  0x44   :  { %520 = vmatprep.subr.bf16.mxu0 %v917_v13  ;;  %v950_v35 = vld [vmem:[#allocation5 + $0x180] ss:$8 sps:$4 sm:$0xff]   ;;  %v951_v36 = vld [vmem:[#allocation5 + $0x94] ss:$8 sps:$4 sm:$0xff]   ;;  %v955_v38 = vld [vmem:[#allocation5 + $0x90] ss:$8 sps:$4 sm:$0xff]  }
  0x45   :  { %v953_v37 = vld [vmem:[#allocation5 + $0x194] ss:$8 sps:$4 sm:$0xff]   ;;  %v956_v39 = vld [vmem:[#allocation5 + $0x190] ss:$8 sps:$4 sm:$0xff]   ;;  %v957_v40 = vld [vmem:[#allocation5 + $0xa4] ss:$8 sps:$4 sm:$0xff]  }
  0x46   :  { %478 = vmatpush1.bf16.msra.mxu1 %v919_v14  ;;  %v959_v41 = vld [vmem:[#allocation5 + $0x1a4] ss:$8 sps:$4 sm:$0xff]   ;;  %v961_v42 = vld [vmem:[#allocation5 + $0xa0] ss:$8 sps:$4 sm:$0xff]   ;;  %v963_v44 = vld [vmem:[#allocation5 + $0xb4] ss:$8 sps:$4 sm:$0xff]  }
  0x47   :  { %521 = vmatpush1.bf16.msra.mxu0 %v920_v15  ;;  %479 = vmatprep.subr.bf16.mxu1 %v921_v16  ;;  %v962_v43 = vld [vmem:[#allocation5 + $0x1a0] ss:$8 sps:$4 sm:$0xff]   ;;  %v965_v45 = vld [vmem:[#allocation5 + $0x1b4] ss:$8 sps:$4 sm:$0xff]   ;;  %v967_v50 = vld [vmem:[#allocation5 + $0xb0] ss:$8 sps:$4 sm:$0xff]  }
  0x48   :  { %522 = vmatprep.subr.bf16.mxu0 %v923_v17  ;;  %v64_v46 = vld [vmem:[#allocation2 + $0x8] sm:$0xff]  ;;  %v66_v48 = vld [vmem:[#allocation2 + $0x18] sm:$0xff]  ;;  %v63_v6 = vld [vmem:[#allocation2] sm:$0xff]  ;;  %s1112_s10 = smov [#allocation8]  }
  0x49   :  { %v68_v47 = vld [vmem:[#allocation2 + $0x28] sm:$0xff]  ;;  %v70_v49 = vld [vmem:[#allocation2 + $0x38] sm:$0xff]  ;;  %v67_v7 = vld [vmem:[#allocation2 + $0x20] sm:$0xff]  ;;  %s754_s11 = sshll.u32 %s1112_s10, 4  ;;  %s755_s11 = int_to_ptr.vmem [resolvable:$true] %s754_s11 }
  0x4a   :  { %480 = vmatpush1.bf16.msra.mxu1 %v925_v18  ;;  %v968_v51 = vld [vmem:[#allocation5 + $0x1b0] ss:$8 sps:$4 sm:$0xff]   ;;  %v969_v52 = vld [vmem:[#allocation5 + $0xc4] ss:$8 sps:$4 sm:$0xff]   ;;  %v72_v53 = vpack.c.bf16 %v68_v47, %v64_v46  ;;  %v74_v54 = vpack.c.bf16 %v70_v49, %v66_v48  ;;  %v973_v56 = vld [vmem:[#allocation5 + $0xc0] ss:$8 sps:$4 sm:$0xff]   ;;  %v71_v11 = vpack.c.bf16 %v67_v7, %v63_v6  ;;  %p1080_p11 = scmp.lt.s32.totalorder %s755_s11, %s755_s11 }
  0x4b   :  { %523 = vmatpush1.bf16.msra.mxu0 %v926_v19  ;;  %481 = vmatprep.subr.bf16.mxu1 %v927_v20  ;;  %v971_v55 = vld [vmem:[#allocation5 + $0x1c4] ss:$8 sps:$4 sm:$0xff]   ;;  %v974_v57 = vld [vmem:[#allocation5 + $0x1c0] ss:$8 sps:$4 sm:$0xff]   ;;  %v975_v58 = vld [vmem:[#allocation5 + $0xd4] ss:$8 sps:$4 sm:$0xff]  }
  0x4c   :  { %524 = vmatprep.subr.bf16.mxu0 %v929_v21  ;;  %503 = vmatprep.mubr.bf16.mxu1 %v72_v53  ;;  %v977_v59 = vld [vmem:[#allocation5 + $0x1d4] ss:$8 sps:$4 sm:$0xff]   ;;  %v979_v60 = vld [vmem:[#allocation5 + $0xd0] ss:$8 sps:$4 sm:$0xff]   ;;  %v981_v62 = vld [vmem:[#allocation5 + $0xe4] ss:$8 sps:$4 sm:$0xff]  }
  0x4d   :  { %546 = vmatprep.mubr.bf16.mxu0 %v74_v54  ;;  %v980_v61 = vld [vmem:[#allocation5 + $0x1d0] ss:$8 sps:$4 sm:$0xff]   ;;  %v983_v63 = vld [vmem:[#allocation5 + $0x1e4] ss:$8 sps:$4 sm:$0xff]   ;;  %v985_v0 = vld [vmem:[#allocation5 + $0xe0] ss:$8 sps:$4 sm:$0xff]  }
  0x4e   :  { %482 = vmatpush1.bf16.msra.mxu1 %v931_v22  ;;  %v986_v1 = vld [vmem:[#allocation5 + $0x1e0] ss:$8 sps:$4 sm:$0xff]   ;;  %v987_v2 = vld [vmem:[#allocation5 + $0xf4] ss:$8 sps:$4 sm:$0xff]   ;;  %v991_v4 = vld [vmem:[#allocation5 + $0xf0] ss:$8 sps:$4 sm:$0xff]  }
  0x4f   :  { %525 = vmatpush1.bf16.msra.mxu0 %v932_v23  ;;  %483 = vmatprep.subr.bf16.mxu1 %v933_v24  ;;  %v989_v3 = vld [vmem:[#allocation5 + $0x1f4] ss:$8 sps:$4 sm:$0xff]   ;;  %v992_v5 = vld [vmem:[#allocation5 + $0x1f0] ss:$8 sps:$4 sm:$0xff]   ;;  %v993_v10 = vld [vmem:[#allocation7 + $0x40] sm:$0xff]   ;;  %s1075_s12 = scalar_lea.vmem %s755_s11, 128 }
  0x50   :  { %526 = vmatprep.subr.bf16.mxu0 %v935_v25  ;;  %v65_v8 = vld [vmem:[#allocation2 + $0x10] sm:$0xff]  ;;  %v994_v13 = vld [vmem:[#allocation7] sm:$0xff]   ;;  %v995_v14 = vld [vmem:[#allocation7 + $0x48] sm:$0xff]   ;;  %p1076_p10 = scmp.ne.s32.totalorder %s755_s11, %s1075_s12  ;;  %p1081_p12 = scmp.lt.s32.totalorder %s1075_s12, %s1075_s12 }
  0x51   :  { %v69_v9 = vld [vmem:[#allocation2 + $0x30] sm:$0xff]  ;;  %v996_v15 = vld [vmem:[#allocation7 + $0x8] sm:$0xff]   ;;  %v999_v18 = vld [vmem:[#allocation7 + $0x58] sm:$0xff]  }
  0x52   :  { %484 = vmatpush1.bf16.msra.mxu1 %v937_v26  ;;  %v73_v12 = vpack.c.bf16 %v69_v9, %v65_v8  ;;  %v997_v16 = vld [vmem:[#allocation7 + $0x50] sm:$0xff]   ;;  %v1000_v19 = vld [vmem:[#allocation7 + $0x18] sm:$0xff]   ;;  %v1001_v20 = vld [vmem:[#allocation7 + $0x60] sm:$0xff]   ;;  %p1082_p13 = por %p1081_p12, %p1080_p11 }
  0x53   :  { %527 = vmatpush1.bf16.msra.mxu0 %v938_v27  ;;  %485 = vmatprep.subr.bf16.mxu1 %v939_v28  ;;  %v998_v17 = vld [vmem:[#allocation7 + $0x10] sm:$0xff]   ;;  %v1002_v21 = vld [vmem:[#allocation7 + $0x20] sm:$0xff]   ;;  %v1003_v22 = vld [vmem:[#allocation7 + $0x68] sm:$0xff]   ;;  %v141_v28 = vlaneseq }
  0x54   :  { %528 = vmatprep.subr.bf16.mxu0 %v941_v29  ;;  %v1004_v23 = vld [vmem:[#allocation7 + $0x28] sm:$0xff]   ;;  %v1005_v24 = vld [vmem:[#allocation7 + $0x70] sm:$0xff]   ;;  %v1007_v26 = vld [vmem:[#allocation7 + $0x78] sm:$0xff]   ;;  %p1083_p0 = pnand %p1082_p13, %p1076_p10 }
  0x55   :  { %v1006_v25 = vld [vmem:[#allocation7 + $0x30] sm:$0xff]   ;;  %v1008_v27 = vld [vmem:[#allocation7 + $0x38] sm:$0xff]   ;;  %v142_v29 = vshrl.u32 %v141_v28, 7 }
  0x56   :  { %486 = vmatpush1.bf16.msra.mxu1 %v943_v30 }
  0x57   :  { %529 = vmatpush1.bf16.msra.mxu0 %v944_v31  ;;  %487 = vmatprep.subr.bf16.mxu1 %v945_v32  ;;  %v143_v30 = vsub.s32 0, %v142_v29  ;;  %v139_v31 = vld [vmem:[%s1205_s2] sm:$0x3]  ;;  %v147_v32 = vsub.s32 1, %v142_v29 }
  0x58   :  { %530 = vmatprep.subr.bf16.mxu0 %v947_v33 }
  0x59   :  { %v144_v33 = vrot.slane %v139_v31, %v143_v30 }
  0x5a   :  { %488 = vmatpush1.bf16.msra.mxu1 %v949_v34  ;;  %v148_v34 = vrot.slane %v139_v31, %v147_v32 }
  0x5b   :  { %531 = vmatpush1.bf16.msra.mxu0 %v950_v35  ;;  %489 = vmatprep.subr.bf16.mxu1 %v951_v36 }
  0x5c   :  { %532 = vmatprep.subr.bf16.mxu0 %v953_v37 }
  0x5e   :  { %490 = vmatpush1.bf16.msra.mxu1 %v955_v38 }
  0x5f   :  { %533 = vmatpush1.bf16.msra.mxu0 %v956_v39  ;;  %491 = vmatprep.subr.bf16.mxu1 %v957_v40 }
  0x60   :  { %534 = vmatprep.subr.bf16.mxu0 %v959_v41 }
  0x62   :  { %492 = vmatpush1.bf16.msra.mxu1 %v961_v42 }
  0x63   :  { %535 = vmatpush1.bf16.msra.mxu0 %v962_v43  ;;  %493 = vmatprep.subr.bf16.mxu1 %v963_v44 }
  0x64   :  { %536 = vmatprep.subr.bf16.mxu0 %v965_v45 }
  0x66   :  { %494 = vmatpush1.bf16.msra.mxu1 %v967_v50 }
  0x67   :  { %537 = vmatpush1.bf16.msra.mxu0 %v968_v51  ;;  %495 = vmatprep.subr.bf16.mxu1 %v969_v52 }
  0x68   :  { %538 = vmatprep.subr.bf16.mxu0 %v971_v55 }
  0x6a   :  { %496 = vmatpush1.bf16.msra.mxu1 %v973_v56 }
  0x6b   :  { %539 = vmatpush1.bf16.msra.mxu0 %v974_v57  ;;  %497 = vmatprep.subr.bf16.mxu1 %v975_v58 }
  0x6c   :  { %540 = vmatprep.subr.bf16.mxu0 %v977_v59 }
  0x6e   :  { %498 = vmatpush1.bf16.msra.mxu1 %v979_v60 }
  0x6f   :  { %541 = vmatpush1.bf16.msra.mxu0 %v980_v61  ;;  %499 = vmatprep.subr.bf16.mxu1 %v981_v62  ;;  %v831_v61 = vld [vmem:[%s1207_s4] ss:$0 sm:$0xff] }
  0x70   :  { %542 = vmatprep.subr.bf16.mxu0 %v983_v63 }
  0x72   :  { %500 = vmatpush1.bf16.msra.mxu1 %v985_v0 }
  0x73   :  { %543 = vmatpush1.bf16.msra.mxu0 %v986_v1  ;;  %501 = vmatprep.subr.bf16.mxu1 %v987_v2 }
  0x74   :  { %544 = vmatprep.subr.bf16.mxu0 %v989_v3 }
  0x76   :  { %502 = vmatpush1.bf16.msra.mxu1 %v991_v4 }
  0x77   :  { %545 = vmatpush1.bf16.msra.mxu0 %v992_v5  ;;  %857 = vmatprep.subr.bf16.mxu1 %v993_v10 }
  0x79   :  { %504 = vmatmul.mubr.bf16.vlgmr.msra.gmra.mrb[0].mxu1 %v71_v11 }
  0x7a   :  { %547 = vmatmul.mubr.bf16.vlgmr.msra.gmra.mrb[0].mxu0 %v73_v12  ;;  %858 = vmatpush3.bf16.msra.mxu1 %v994_v13 }
  0x7b   :  { %859 = vmatprep.subr.bf16.mxu1 %v995_v14 }
  0x7e   :  { %860 = vmatpush3.bf16.msra.mxu1 %v996_v15 }
  0x7f   :  { %861 = vmatprep.subr.bf16.mxu1 %v997_v16 }
  0x82   :  { %862 = vmatpush3.bf16.msra.mxu1 %v998_v17 }
  0x83   :  { %863 = vmatprep.subr.bf16.mxu1 %v999_v18 }
  0x86   :  { %864 = vmatpush3.bf16.msra.mxu1 %v1000_v19 }
  0x87   :  { %865 = vmatprep.subr.bf16.mxu1 %v1001_v20 }
  0x8a   :  { %866 = vmatpush3.bf16.msra.mxu1 %v1002_v21 }
  0x8b   :  { %867 = vmatprep.subr.bf16.mxu1 %v1003_v22 }
  0x8e   :  { %868 = vmatpush3.bf16.msra.mxu1 %v1004_v23 }
  0x8f   :  { %869 = vmatprep.subr.bf16.mxu1 %v1005_v24 }
  0x92   :  { %870 = vmatpush3.bf16.msra.mxu1 %v1006_v25 }
  0x93   :  { %871 = vmatprep.subr.bf16.mxu1 %v1007_v26 }
  0x96   :  { %872 = vmatpush3.bf16.msra.mxu1 %v1008_v27 }
 0x14c   :  { %v505_v35 = vpop.f32.mrb[0].mxu1 }
 0x14d   :  { %v548_v36 = vpop.f32.mrb[0].mxu0  ;;  %v506_v37 = vadd.f32 %v505_v35, %v144_v33  ;;  %v507_v38 = vpop.f32.mrb[1].mxu1 }
 0x14e   :  { %v550_v39 = vpop.f32.mrb[1].mxu0  ;;  %v508_v40 = vadd.f32 %v507_v38, %v148_v34  ;;  %v509_v41 = vpop.f32.mrb[2].mxu1 }
 0x14f   :  { %v552_v42 = vpop.f32.mrb[2].mxu0  ;;  %v549_v43 = vadd.f32 %v548_v36, %v506_v37  ;;  %v510_v44 = vadd.f32 %v509_v41, %v144_v33  ;;  %v511_v45 = vpop.f32.mrb[3].mxu1 }
 0x150   :  { %v554_v46 = vpop.f32.mrb[3].mxu0  ;;  %v551_v47 = vadd.f32 %v550_v39, %v508_v40  ;;  %v512_v48 = vadd.f32 %v511_v45, %v148_v34 }
 0x151   :  { %v553_v49 = vadd.f32 %v552_v42, %v510_v44  ;;  %v557_v51 = vmax.f32 %v549_v43, 0.0 }
 0x152   :  { %v555_v50 = vadd.f32 %v554_v46, %v512_v48  ;;  %v558_v53 = vmax.f32 %v551_v47, 0.0 }
 0x153   :  { %v559_v52 = vmax.f32 %v553_v49, 0.0 }
 0x154   :  { %v560_v54 = vmax.f32 %v555_v50, 0.0 }
 0x155   :  { %v561_v55 = vpack.c.bf16 %v559_v52, %v557_v51 }
 0x156   :  { %v562_v56 = vpack.c.bf16 %v560_v54, %v558_v53 }
 0x158   :  { %730 = vmatprep.mubr.bf16.mxu1 %v562_v56 }
 0x159   :  { %731 = vmatmul.mubr.bf16.vlgmr.msra.gmra.mrb[4].mxu1 %v561_v55 }
 0x22c   :  { %v873_v57 = vpop.f32.mrb[4].mxu1 }
 0x22d   :  { %v874_v58 = vpop.f32.mrb[5].mxu1 }
 0x22e   :  { %v875_v59 = vadd.f32 %v874_v58, %v873_v57  ;;  %v876_v60 = vpop.f32.mrb[6].mxu1 }
 0x22f   :  { %v877_v62 = vpop.f32.mrb[7].mxu1 }
 0x230   :  { %v878_v63 = vadd.f32 %v877_v62, %v876_v60  ;;  %v733_v0 = vadd.f32 %v875_v59, %v831_v61 }
 0x232   :  { %v736_v1 = vadd.f32 %v878_v63, %v831_v61 }
 0x234   :  { %v855_v2 = vpack.c.bf16 %v736_v1, %v733_v0 }
 0x236   :  { %856 = vst [vmem:[#allocation8] sm:$0xff] %v855_v2  }
 0x237   :  { %1086 = shalt.err (!%p1083_p0)
}
 0x238   :  { %s1087_s4 = scalar_lea.hbm %s1208_s5, 128 }
 0x239   :  { %p1088_p1 = scmp.ne.s32.totalorder %s1208_s5, %s1087_s4  ;;  %p1091_p2 = scmp.lt.u32.totalorder %s1087_s4, %s1208_s5 }
 0x23b   :  { %p1093_p3 = pnand %p1091_p2, %p1088_p1 }
 0x23d   :  { %1096 = shalt.err (!%p1093_p3)
}
 0x23e   :  { %760 = dma.vmem_to_hbm [thread:$0]  %s755_s11, 128, %s1208_s5, [#allocation4], %s1110_s0, %s1110_s0, %s1111_s30  }
 0x23f   :  { %1101 = dma.done.wait [#allocation4], 128  }
 0x240   :  { %1102 = vsyncadd [#allocation4], 4294967168 }
 0x241   :  { %764 = vsyncpa [#allocation3], 1 }
 0x242   :  { %765 = vsyncpa [#allocation6], 1 }
 0x243   :  { %766 = vsyncpa [#allocation4], 1 }

</bundles_post_ra>
